<compile_context>
chip_gen: v6e
topology: v6e:2x2x1
jax: 0.10.0
libtpu: 0.0.40
codegen_flags: <defaults>
</compile_context>

<pallas_src>
from functools import partial

import jax
import jax.numpy as jnp
from jax.experimental import pallas as pl
from jax.experimental.pallas import tpu as pltpu

BASE_SIGNAL = 0.1      # module default base_signal
MAX_SIGNAL = 1e-4      # module default max_signal
NOISE_SCALE = 1.0      # module default noise_scale


def _rollout_kernel(theta_ref, eps_ref,
                    wc_ref, we1y_ref, bce_ref, we2_ref, be2_ref,
                    wm1_ref, bm1_ref, wm2_ref, bm2_ref,
                    designs_ref, obs_ref,
                    *, T, K, p, H, mxu_dtype):
    """Whole T-step rollout for one batch tile (tb lanes).

    Batch-on-lanes layout:
      theta_ref (K*p, tb) f32, eps_ref (T, tb) f32,
      designs_ref (T*p, tb) f32 (flattened), obs_ref (T, tb) f32 (flattened).
    """
    theta = theta_ref[...]                                   # (K*p, tb) f32
    tb = theta.shape[-1]
    eps = eps_ref[...]                                       # (T, tb) f32, hoisted

    def mx(x):
        return x if x.dtype == mxu_dtype else x.astype(mxu_dtype)

    # Loop-invariant weight loads (hoisted; cast once if running bf16 MXU operands).
    wc = mx(wc_ref[...])                                     # (H, H) folded we1x@wm2
    we2 = mx(we2_ref[...])                                   # (H, H)
    wm1 = mx(wm1_ref[...])                                   # (H, H)
    wm2 = mx(wm2_ref[...])                                   # (p, H)

    # Hoisted lane-broadcasts of the biases (JAX does not CSE broadcast_in_dim, so
    # doing these inside the loop would re-emit 5 broadcasts per step).
    bm1_b = jnp.broadcast_to(bm1_ref[...], (H, tb))          # emitter L1 bias
    bm2_b = jnp.broadcast_to(bm2_ref[...], (p, tb))          # emitter L2 bias
    bce_b = jnp.broadcast_to(bce_ref[...], (H, tb))          # folded we1x@bm2 + be1
    be2_b = jnp.broadcast_to(be2_ref[...], (H, tb))          # encoder L2 bias
    we1y_b = jnp.broadcast_to(we1y_ref[...], (H, tb))        # encoder L1 y-column

    # Per-object latent slices (static slices, hoisted).
    theta_k = [theta[k * p:(k + 1) * p, :] for k in range(K)]

    # Pooled history representation, kept in registers (no VMEM scratch traffic).
    r = jnp.zeros((H, tb), jnp.float32)

    # Full unroll: T is a small static constant, so a Python-level unroll gives the
    # LLO scheduler one straight-line block AND static (lane-dense) store offsets.
    for t in range(T):
        # ---- emitter MLP: history -> design xi_t; f32 accumulate on the MXU ----
        h = jnp.maximum(
            jnp.dot(wm1, mx(r), preferred_element_type=jnp.float32) + bm1_b, 0.0)
        hm = mx(h)                                           # reused by wm2 and wc
        xi = jnp.dot(wm2, hm, preferred_element_type=jnp.float32) + bm2_b   # (p, tb)

        # ---- forward_map (f32): log(base + sum_k 1/(max_sig + ||xi - theta_k||^2)) ----
        acc = jnp.zeros((1, tb), jnp.float32)
        for k in range(K):
            diff = xi - theta_k[k]                           # (p, tb)
            # explicit unrolled sum over the p(=2) rows: VPU mul+add, no XLU reduce
            sq = diff[0:1, :] * diff[0:1, :]
            for i in range(1, p):
                sq = sq + diff[i:i + 1, :] * diff[i:i + 1, :]
            acc = acc + 1.0 / (MAX_SIGNAL + sq)   # exact divide: approx reciprocal
                                                  # would distort log() near xi==theta_k
        mean_y = jnp.log(BASE_SIGNAL + acc)                  # (1, tb)

        # ---- observation: y ~ Normal(mean_y, noise_scale), eps pre-sampled ----
        y = mean_y + NOISE_SCALE * eps[t:t + 1, :]           # (1, tb)

        # ---- encoder MLP over (xi, y); first-layer xi path pre-folded:
        #      relu(we1x@xi + we1y*y + be1) == relu(wc@h + bce + we1y*y) ----
        he = jnp.maximum(
            jnp.dot(wc, hm, preferred_element_type=jnp.float32)
            + we1y_b * y + bce_b, 0.0)                       # (H, tb)
        e = jnp.maximum(
            jnp.dot(we2, mx(he), preferred_element_type=jnp.float32) + be2_b, 0.0)
        r = r + e                                            # sum-pool history

        # Static, lane-dense (tb-wide) stores into the flattened output slabs.
        designs_ref[t * p:(t + 1) * p, :] = xi
        obs_ref[t:t + 1, :] = y


def _choose_tb(B, tb):
    """Keep tb a multiple of 128; halve it while that yields >=2 batch tiles so the
    v7x megacore ('parallel' grid axis) gets work on both TensorCores."""
    tb = max(128, (tb // 128) * 128)
    while tb > 128 and (B + tb - 1) // tb < 2:
        tb = max(128, ((tb // 2) // 128) * 128)
    return tb


def hidden_objects_var_forward(theta, eps, params, *, T, K, p, H, tb=128,
                               mxu_dtype=jnp.float32):
    """Run the policy for a given theta.

    theta: (B, K*p) f32, eps: (T, B, 1) f32 pre-sampled N(0,1) observation noise.
    Returns (designs (T, B, p), observations (T, B, 1)).
    tb: batch tile / lane width (multiple of 128; use 256+ on v6e/v7x for large B).
    """
    B = theta.shape[0]
    tb = _choose_tb(B, tb)
    n_tiles = pl.cdiv(B, tb)
    B_pad = n_tiles * tb

    (we1x, we1y, be1, we2, be2, wm1, bm1, wm2, bm2) = params

    # Pre-fold the encoder first layer's xi path into the emitter output (host-side,
    # f32): we1x @ xi = (we1x @ wm2) @ h + we1x @ bm2.  Removes the tiny
    # p-contraction matmul from the per-step serial chain inside the kernel.
    wc = we1x @ wm2                                          # (H, H)
    bce = we1x @ bm2 + be1                                   # (H, 1)

    if mxu_dtype != jnp.float32:
        # bf16 MXU operands (optional): cast the weights once host-side.
        wc = wc.astype(mxu_dtype)
        we2 = we2.astype(mxu_dtype)
        wm1 = wm1.astype(mxu_dtype)
        wm2 = wm2.astype(mxu_dtype)

    # Batch-on-lanes layout (+ pad batch up to a multiple of the tile).
    theta_t = jnp.transpose(theta)                           # (K*p, B)
    eps_t = eps[..., 0]                                      # (T, B), lane-dense rows
    if B_pad != B:
        theta_t = jnp.pad(theta_t, ((0, 0), (0, B_pad - B)))
        eps_t = jnp.pad(eps_t, ((0, 0), (0, B_pad - B)))

    def full_spec(arr):
        # whole (small) parameter array resident in VMEM for every grid step
        nd = arr.ndim
        return pl.BlockSpec(arr.shape, lambda i, _nd=nd: (0,) * _nd)

    in_specs = [
        pl.BlockSpec((K * p, tb), lambda i: (0, i)),         # theta (features, lanes)
        pl.BlockSpec((T, tb), lambda i: (0, i)),             # eps   (steps, lanes)
        full_spec(wc), full_spec(we1y), full_spec(bce),
        full_spec(we2), full_spec(be2),
        full_spec(wm1), full_spec(bm1),
        full_spec(wm2), full_spec(bm2),
    ]
    # Flattened 2D outputs: one 8-sublane pad total per output, lane-dense writeback.
    out_specs = (
        pl.BlockSpec((T * p, tb), lambda i: (0, i)),         # designs slab
        pl.BlockSpec((T, tb), lambda i: (0, i)),             # observations slab
    )
    out_shape = (
        jax.ShapeDtypeStruct((T * p, B_pad), jnp.float32),
        jax.ShapeDtypeStruct((T, B_pad), jnp.float32),
    )

    kernel = partial(_rollout_kernel, T=T, K=K, p=p, H=H, mxu_dtype=mxu_dtype)
    designs_f, obs_f = pl.pallas_call(
        kernel,
        out_shape=out_shape,
        grid_spec=pltpu.PrefetchScalarGridSpec(
            num_scalar_prefetch=0,
            grid=(n_tiles,),
            in_specs=in_specs,
            out_specs=out_specs,
        ),
        compiler_params=pltpu.CompilerParams(
            dimension_semantics=("parallel",)),
    )(theta_t, eps_t, wc, we1y, bce, we2, be2, wm1, bm1, wm2, bm2)

    # Back to the module's (T, B, p) / (T, B, 1) layout; drop the batch padding.
    designs = jnp.transpose(designs_f.reshape(T, p, B_pad), (0, 2, 1))[:, :B, :]
    observations = jnp.transpose(obs_f.reshape(T, 1, B_pad), (0, 2, 1))[:, :B, :]
    return designs, observations


def init_params(key, *, p, H):
    """Deterministic synthetic design-net parameters (encoder + emitter MLPs),
    stored as (out_features, in_features) / (out_features, 1) for the
    batch-on-lanes kernel layout."""
    ks = jax.random.split(key, 9)
    s = 0.1
    we1x = s * jax.random.normal(ks[0], (H, p), jnp.float32)   # encoder L1, xi part
    we1y = s * jax.random.normal(ks[1], (H, 1), jnp.float32)   # encoder L1, y part
    be1 = s * jax.random.normal(ks[2], (H, 1), jnp.float32)
    we2 = s * jax.random.normal(ks[3], (H, H), jnp.float32)
    be2 = s * jax.random.normal(ks[4], (H, 1), jnp.float32)
    wm1 = s * jax.random.normal(ks[5], (H, H), jnp.float32)    # emitter
    bm1 = s * jax.random.normal(ks[6], (H, 1), jnp.float32)
    wm2 = s * jax.random.normal(ks[7], (p, H), jnp.float32)
    bm2 = s * jax.random.normal(ks[8], (p, 1), jnp.float32)
    return (we1x, we1y, be1, we2, be2, wm1, bm1, wm2, bm2)


if __name__ == "__main__":
    # Small shapes consistent with the module: K hidden objects in p dims, T steps.
    B, K, p, T, H = 16, 2, 2, 2, 32

    key = jax.random.PRNGKey(0)
    k_theta, k_eps, k_params = jax.random.split(key, 3)

    # theta ~ N(0, I) over K*p dims (the module's default MultivariateNormal prior).
    theta = jax.random.normal(k_theta, (B, K * p), jnp.float32)
    # Pre-sampled standard-normal observation noise (one draw per step per batch).
    eps = jax.random.normal(k_eps, (T, B, 1), jnp.float32)

    params = init_params(k_params, p=p, H=H)

    designs, observations = hidden_objects_var_forward(
        theta, eps, params, T=T, K=K, p=p, H=H, tb=128)
    jax.block_until_ready((designs, observations))

    assert designs.shape == (T, B, p)
    assert observations.shape == (T, B, 1)
    assert bool(jnp.all(jnp.isfinite(designs)))
    assert bool(jnp.all(jnp.isfinite(observations)))
    print("KERNEL_OK")
</pallas_src>

<mosaic_0001>
module attributes {stable_mosaic.version = 11 : i64} {
  func.func @_rollout_kernel(%arg0: i32, %arg1: memref<4x128xf32, #tpu.memory_space<vmem>>, %arg2: memref<2x128xf32, #tpu.memory_space<vmem>>, %arg3: memref<32x32xf32, #tpu.memory_space<vmem>>, %arg4: memref<32x1xf32, #tpu.memory_space<vmem>>, %arg5: memref<32x1xf32, #tpu.memory_space<vmem>>, %arg6: memref<32x32xf32, #tpu.memory_space<vmem>>, %arg7: memref<32x1xf32, #tpu.memory_space<vmem>>, %arg8: memref<32x32xf32, #tpu.memory_space<vmem>>, %arg9: memref<32x1xf32, #tpu.memory_space<vmem>>, %arg10: memref<2x32xf32, #tpu.memory_space<vmem>>, %arg11: memref<2x1xf32, #tpu.memory_space<vmem>>, %arg12: memref<4x128xf32, #tpu.memory_space<vmem>>, %arg13: memref<2x128xf32, #tpu.memory_space<vmem>>) attributes {dimension_semantics = [#tpu.dimension_semantics<parallel>], iteration_bounds = array<i64: 1>, scalar_prefetch = 0 : i64, scratch_operands = 0 : i64, tpu.core_type = #tpu.core_type<tc>, window_params = [{transform_indices = @transform_0, window_bounds = array<i64: 4, 128>}, {transform_indices = @transform_1, window_bounds = array<i64: 2, 128>}, {pipeline_mode = #tpu.pipeline_mode<synchronous>, transform_indices = @transform_2, window_bounds = array<i64: 32, 32>}, {pipeline_mode = #tpu.pipeline_mode<synchronous>, transform_indices = @transform_3, window_bounds = array<i64: 32, 1>}, {pipeline_mode = #tpu.pipeline_mode<synchronous>, transform_indices = @transform_4, window_bounds = array<i64: 32, 1>}, {pipeline_mode = #tpu.pipeline_mode<synchronous>, transform_indices = @transform_5, window_bounds = array<i64: 32, 32>}, {pipeline_mode = #tpu.pipeline_mode<synchronous>, transform_indices = @transform_6, window_bounds = array<i64: 32, 1>}, {pipeline_mode = #tpu.pipeline_mode<synchronous>, transform_indices = @transform_7, window_bounds = array<i64: 32, 32>}, {pipeline_mode = #tpu.pipeline_mode<synchronous>, transform_indices = @transform_8, window_bounds = array<i64: 32, 1>}, {pipeline_mode = #tpu.pipeline_mode<synchronous>, transform_indices = @transform_9, window_bounds = array<i64: 2, 32>}, {pipeline_mode = #tpu.pipeline_mode<synchronous>, transform_indices = @transform_10, window_bounds = array<i64: 2, 1>}, {transform_indices = @transform_11, window_bounds = array<i64: 4, 128>}, {transform_indices = @transform_12, window_bounds = array<i64: 2, 128>}]} {
    %c0 = arith.constant 0 : index
    %c0_0 = arith.constant 0 : index
    %0 = vector.load %arg1[%c0, %c0_0] : memref<4x128xf32, #tpu.memory_space<vmem>>, vector<4x128xf32>
    %c0_1 = arith.constant 0 : index
    %c0_2 = arith.constant 0 : index
    %1 = vector.load %arg2[%c0_1, %c0_2] : memref<2x128xf32, #tpu.memory_space<vmem>>, vector<2x128xf32>
    %c0_3 = arith.constant 0 : index
    %c0_4 = arith.constant 0 : index
    %2 = vector.load %arg3[%c0_3, %c0_4] : memref<32x32xf32, #tpu.memory_space<vmem>>, vector<32x32xf32>
    %c0_5 = arith.constant 0 : index
    %c0_6 = arith.constant 0 : index
    %3 = vector.load %arg6[%c0_5, %c0_6] : memref<32x32xf32, #tpu.memory_space<vmem>>, vector<32x32xf32>
    %c0_7 = arith.constant 0 : index
    %c0_8 = arith.constant 0 : index
    %4 = vector.load %arg8[%c0_7, %c0_8] : memref<32x32xf32, #tpu.memory_space<vmem>>, vector<32x32xf32>
    %c0_9 = arith.constant 0 : index
    %c0_10 = arith.constant 0 : index
    %5 = vector.load %arg10[%c0_9, %c0_10] : memref<2x32xf32, #tpu.memory_space<vmem>>, vector<2x32xf32>
    %c0_11 = arith.constant 0 : index
    %c0_12 = arith.constant 0 : index
    %6 = vector.load %arg9[%c0_11, %c0_12] : memref<32x1xf32, #tpu.memory_space<vmem>>, vector<32x1xf32>
    %7 = vector.shape_cast %6 : vector<32x1xf32> to vector<32x1xf32>
    %8 = vector.broadcast %7 : vector<32x1xf32> to vector<32x128xf32>
    %c0_13 = arith.constant 0 : index
    %c0_14 = arith.constant 0 : index
    %9 = vector.load %arg11[%c0_13, %c0_14] : memref<2x1xf32, #tpu.memory_space<vmem>>, vector<2x1xf32>
    %10 = vector.shape_cast %9 : vector<2x1xf32> to vector<2x1xf32>
    %11 = vector.broadcast %10 : vector<2x1xf32> to vector<2x128xf32>
    %c0_15 = arith.constant 0 : index
    %c0_16 = arith.constant 0 : index
    %12 = vector.load %arg5[%c0_15, %c0_16] : memref<32x1xf32, #tpu.memory_space<vmem>>, vector<32x1xf32>
    %13 = vector.shape_cast %12 : vector<32x1xf32> to vector<32x1xf32>
    %14 = vector.broadcast %13 : vector<32x1xf32> to vector<32x128xf32>
    %c0_17 = arith.constant 0 : index
    %c0_18 = arith.constant 0 : index
    %15 = vector.load %arg7[%c0_17, %c0_18] : memref<32x1xf32, #tpu.memory_space<vmem>>, vector<32x1xf32>
    %16 = vector.shape_cast %15 : vector<32x1xf32> to vector<32x1xf32>
    %17 = vector.broadcast %16 : vector<32x1xf32> to vector<32x128xf32>
    %c0_19 = arith.constant 0 : index
    %c0_20 = arith.constant 0 : index
    %18 = vector.load %arg4[%c0_19, %c0_20] : memref<32x1xf32, #tpu.memory_space<vmem>>, vector<32x1xf32>
    %19 = vector.shape_cast %18 : vector<32x1xf32> to vector<32x1xf32>
    %20 = vector.broadcast %19 : vector<32x1xf32> to vector<32x128xf32>
    %21 = vector.extract_strided_slice %0 {offsets = [0, 0], sizes = [2, 128], strides = [1, 1]} : vector<4x128xf32> to vector<2x128xf32>
    %22 = vector.extract_strided_slice %0 {offsets = [2, 0], sizes = [2, 128], strides = [1, 1]} : vector<4x128xf32> to vector<2x128xf32>
    %cst = arith.constant 0.000000e+00 : f32
    %23 = vector.broadcast %cst : f32 to vector<32x128xf32>
    %cst_21 = arith.constant dense<0.000000e+00> : vector<32x128xf32>
    %24 = tpu.matmul %4, %23, %cst_21 {dimension_numbers = #tpu.dot_dimension_numbers<[1], [0], [0], [1], [0, 0, 1, 1], [], []>} : vector<32x32xf32>, vector<32x128xf32>, vector<32x128xf32> -> vector<32x128xf32>
    %25 = arith.addf %24, %8 : vector<32x128xf32>
    %cst_22 = arith.constant 0.000000e+00 : f32
    %26 = vector.broadcast %cst_22 : f32 to vector<32x128xf32>
    %27 = arith.maximumf %25, %26 : vector<32x128xf32>
    %cst_23 = arith.constant dense<0.000000e+00> : vector<2x128xf32>
    %28 = tpu.matmul %5, %27, %cst_23 {dimension_numbers = #tpu.dot_dimension_numbers<[1], [0], [0], [1], [0, 0, 1, 1], [], []>} : vector<2x32xf32>, vector<32x128xf32>, vector<2x128xf32> -> vector<2x128xf32>
    %29 = arith.addf %28, %11 : vector<2x128xf32>
    %cst_24 = arith.constant 0.000000e+00 : f32
    %30 = vector.broadcast %cst_24 : f32 to vector<1x128xf32>
    %31 = arith.subf %29, %21 : vector<2x128xf32>
    %32 = vector.extract_strided_slice %31 {offsets = [0, 0], sizes = [1, 128], strides = [1, 1]} : vector<2x128xf32> to vector<1x128xf32>
    %33 = vector.extract_strided_slice %31 {offsets = [0, 0], sizes = [1, 128], strides = [1, 1]} : vector<2x128xf32> to vector<1x128xf32>
    %34 = arith.mulf %32, %33 : vector<1x128xf32>
    %35 = vector.extract_strided_slice %31 {offsets = [1, 0], sizes = [1, 128], strides = [1, 1]} : vector<2x128xf32> to vector<1x128xf32>
    %36 = vector.extract_strided_slice %31 {offsets = [1, 0], sizes = [1, 128], strides = [1, 1]} : vector<2x128xf32> to vector<1x128xf32>
    %37 = arith.mulf %35, %36 : vector<1x128xf32>
    %38 = arith.addf %34, %37 : vector<1x128xf32>
    %cst_25 = arith.constant 9.99999974E-5 : f32
    %39 = vector.broadcast %cst_25 : f32 to vector<1x128xf32>
    %40 = arith.addf %39, %38 : vector<1x128xf32>
    %cst_26 = arith.constant 1.000000e+00 : f32
    %41 = vector.broadcast %cst_26 : f32 to vector<1x128xf32>
    %42 = arith.divf %41, %40 : vector<1x128xf32>
    %43 = arith.addf %30, %42 : vector<1x128xf32>
    %44 = arith.subf %29, %22 : vector<2x128xf32>
    %45 = vector.extract_strided_slice %44 {offsets = [0, 0], sizes = [1, 128], strides = [1, 1]} : vector<2x128xf32> to vector<1x128xf32>
    %46 = vector.extract_strided_slice %44 {offsets = [0, 0], sizes = [1, 128], strides = [1, 1]} : vector<2x128xf32> to vector<1x128xf32>
    %47 = arith.mulf %45, %46 : vector<1x128xf32>
    %48 = vector.extract_strided_slice %44 {offsets = [1, 0], sizes = [1, 128], strides = [1, 1]} : vector<2x128xf32> to vector<1x128xf32>
    %49 = vector.extract_strided_slice %44 {offsets = [1, 0], sizes = [1, 128], strides = [1, 1]} : vector<2x128xf32> to vector<1x128xf32>
    %50 = arith.mulf %48, %49 : vector<1x128xf32>
    %51 = arith.addf %47, %50 : vector<1x128xf32>
    %cst_27 = arith.constant 9.99999974E-5 : f32
    %52 = vector.broadcast %cst_27 : f32 to vector<1x128xf32>
    %53 = arith.addf %52, %51 : vector<1x128xf32>
    %cst_28 = arith.constant 1.000000e+00 : f32
    %54 = vector.broadcast %cst_28 : f32 to vector<1x128xf32>
    %55 = arith.divf %54, %53 : vector<1x128xf32>
    %56 = arith.addf %43, %55 : vector<1x128xf32>
    %cst_29 = arith.constant 1.000000e-01 : f32
    %57 = vector.broadcast %cst_29 : f32 to vector<1x128xf32>
    %58 = arith.addf %57, %56 : vector<1x128xf32>
    %59 = math.log %58 : vector<1x128xf32>
    %60 = vector.extract_strided_slice %1 {offsets = [0, 0], sizes = [1, 128], strides = [1, 1]} : vector<2x128xf32> to vector<1x128xf32>
    %cst_30 = arith.constant 1.000000e+00 : f32
    %61 = vector.broadcast %cst_30 : f32 to vector<1x128xf32>
    %62 = arith.mulf %61, %60 : vector<1x128xf32>
    %63 = arith.addf %59, %62 : vector<1x128xf32>
    %cst_31 = arith.constant dense<0.000000e+00> : vector<32x128xf32>
    %64 = tpu.matmul %2, %27, %cst_31 {dimension_numbers = #tpu.dot_dimension_numbers<[1], [0], [0], [1], [0, 0, 1, 1], [], []>} : vector<32x32xf32>, vector<32x128xf32>, vector<32x128xf32> -> vector<32x128xf32>
    %65 = vector.broadcast %63 : vector<1x128xf32> to vector<32x128xf32>
    %66 = arith.mulf %20, %65 : vector<32x128xf32>
    %67 = arith.addf %64, %66 : vector<32x128xf32>
    %68 = arith.addf %67, %14 : vector<32x128xf32>
    %cst_32 = arith.constant 0.000000e+00 : f32
    %69 = vector.broadcast %cst_32 : f32 to vector<32x128xf32>
    %70 = arith.maximumf %68, %69 : vector<32x128xf32>
    %cst_33 = arith.constant dense<0.000000e+00> : vector<32x128xf32>
    %71 = tpu.matmul %3, %70, %cst_33 {dimension_numbers = #tpu.dot_dimension_numbers<[1], [0], [0], [1], [0, 0, 1, 1], [], []>} : vector<32x32xf32>, vector<32x128xf32>, vector<32x128xf32> -> vector<32x128xf32>
    %72 = arith.addf %71, %17 : vector<32x128xf32>
    %cst_34 = arith.constant 0.000000e+00 : f32
    %73 = vector.broadcast %cst_34 : f32 to vector<32x128xf32>
    %74 = arith.maximumf %72, %73 : vector<32x128xf32>
    %75 = arith.addf %23, %74 : vector<32x128xf32>
    %c0_35 = arith.constant 0 : index
    %c0_36 = arith.constant 0 : index
    %76 = vector.load %arg12[%c0_35, %c0_36] : memref<4x128xf32, #tpu.memory_space<vmem>>, vector<2x128xf32>
    tpu.vector_store %arg12[%c0_35, %c0_36], %29 {strides = array<i32>} : memref<4x128xf32, #tpu.memory_space<vmem>>, vector<2x128xf32>,
    %c0_37 = arith.constant 0 : index
    %c0_38 = arith.constant 0 : index
    %77 = vector.load %arg13[%c0_37, %c0_38] : memref<2x128xf32, #tpu.memory_space<vmem>>, vector<1x128xf32>
    tpu.vector_store %arg13[%c0_37, %c0_38], %63 {strides = array<i32>} : memref<2x128xf32, #tpu.memory_space<vmem>>, vector<1x128xf32>,
    %cst_39 = arith.constant dense<0.000000e+00> : vector<32x128xf32>
    %78 = tpu.matmul %4, %75, %cst_39 {dimension_numbers = #tpu.dot_dimension_numbers<[1], [0], [0], [1], [0, 0, 1, 1], [], []>} : vector<32x32xf32>, vector<32x128xf32>, vector<32x128xf32> -> vector<32x128xf32>
    %79 = arith.addf %78, %8 : vector<32x128xf32>
    %cst_40 = arith.constant 0.000000e+00 : f32
    %80 = vector.broadcast %cst_40 : f32 to vector<32x128xf32>
    %81 = arith.maximumf %79, %80 : vector<32x128xf32>
    %cst_41 = arith.constant dense<0.000000e+00> : vector<2x128xf32>
    %82 = tpu.matmul %5, %81, %cst_41 {dimension_numbers = #tpu.dot_dimension_numbers<[1], [0], [0], [1], [0, 0, 1, 1], [], []>} : vector<2x32xf32>, vector<32x128xf32>, vector<2x128xf32> -> vector<2x128xf32>
    %83 = arith.addf %82, %11 : vector<2x128xf32>
    %cst_42 = arith.constant 0.000000e+00 : f32
    %84 = vector.broadcast %cst_42 : f32 to vector<1x128xf32>
    %85 = arith.subf %83, %21 : vector<2x128xf32>
    %86 = vector.extract_strided_slice %85 {offsets = [0, 0], sizes = [1, 128], strides = [1, 1]} : vector<2x128xf32> to vector<1x128xf32>
    %87 = vector.extract_strided_slice %85 {offsets = [0, 0], sizes = [1, 128], strides = [1, 1]} : vector<2x128xf32> to vector<1x128xf32>
    %88 = arith.mulf %86, %87 : vector<1x128xf32>
    %89 = vector.extract_strided_slice %85 {offsets = [1, 0], sizes = [1, 128], strides = [1, 1]} : vector<2x128xf32> to vector<1x128xf32>
    %90 = vector.extract_strided_slice %85 {offsets = [1, 0], sizes = [1, 128], strides = [1, 1]} : vector<2x128xf32> to vector<1x128xf32>
    %91 = arith.mulf %89, %90 : vector<1x128xf32>
    %92 = arith.addf %88, %91 : vector<1x128xf32>
    %cst_43 = arith.constant 9.99999974E-5 : f32
    %93 = vector.broadcast %cst_43 : f32 to vector<1x128xf32>
    %94 = arith.addf %93, %92 : vector<1x128xf32>
    %cst_44 = arith.constant 1.000000e+00 : f32
    %95 = vector.broadcast %cst_44 : f32 to vector<1x128xf32>
    %96 = arith.divf %95, %94 : vector<1x128xf32>
    %97 = arith.addf %84, %96 : vector<1x128xf32>
    %98 = arith.subf %83, %22 : vector<2x128xf32>
    %99 = vector.extract_strided_slice %98 {offsets = [0, 0], sizes = [1, 128], strides = [1, 1]} : vector<2x128xf32> to vector<1x128xf32>
    %100 = vector.extract_strided_slice %98 {offsets = [0, 0], sizes = [1, 128], strides = [1, 1]} : vector<2x128xf32> to vector<1x128xf32>
    %101 = arith.mulf %99, %100 : vector<1x128xf32>
    %102 = vector.extract_strided_slice %98 {offsets = [1, 0], sizes = [1, 128], strides = [1, 1]} : vector<2x128xf32> to vector<1x128xf32>
    %103 = vector.extract_strided_slice %98 {offsets = [1, 0], sizes = [1, 128], strides = [1, 1]} : vector<2x128xf32> to vector<1x128xf32>
    %104 = arith.mulf %102, %103 : vector<1x128xf32>
    %105 = arith.addf %101, %104 : vector<1x128xf32>
    %cst_45 = arith.constant 9.99999974E-5 : f32
    %106 = vector.broadcast %cst_45 : f32 to vector<1x128xf32>
    %107 = arith.addf %106, %105 : vector<1x128xf32>
    %cst_46 = arith.constant 1.000000e+00 : f32
    %108 = vector.broadcast %cst_46 : f32 to vector<1x128xf32>
    %109 = arith.divf %108, %107 : vector<1x128xf32>
    %110 = arith.addf %97, %109 : vector<1x128xf32>
    %cst_47 = arith.constant 1.000000e-01 : f32
    %111 = vector.broadcast %cst_47 : f32 to vector<1x128xf32>
    %112 = arith.addf %111, %110 : vector<1x128xf32>
    %113 = math.log %112 : vector<1x128xf32>
    %114 = vector.extract_strided_slice %1 {offsets = [1, 0], sizes = [1, 128], strides = [1, 1]} : vector<2x128xf32> to vector<1x128xf32>
    %cst_48 = arith.constant 1.000000e+00 : f32
    %115 = vector.broadcast %cst_48 : f32 to vector<1x128xf32>
    %116 = arith.mulf %115, %114 : vector<1x128xf32>
    %117 = arith.addf %113, %116 : vector<1x128xf32>
    %c2 = arith.constant 2 : index
    %c0_49 = arith.constant 0 : index
    %118 = vector.load %arg12[%c2, %c0_49] : memref<4x128xf32, #tpu.memory_space<vmem>>, vector<2x128xf32>
    tpu.vector_store %arg12[%c2, %c0_49], %83 {strides = array<i32>} : memref<4x128xf32, #tpu.memory_space<vmem>>, vector<2x128xf32>,
    %c1 = arith.constant 1 : index
    %c0_50 = arith.constant 0 : index
    %119 = vector.load %arg13[%c1, %c0_50] : memref<2x128xf32, #tpu.memory_space<vmem>>, vector<1x128xf32>
    tpu.vector_store %arg13[%c1, %c0_50], %117 {strides = array<i32>} : memref<2x128xf32, #tpu.memory_space<vmem>>, vector<1x128xf32>,
    return
  }
  func.func @transform_0(%arg0: i32) -> (i32, i32) {
    %c0_i32 = arith.constant 0 : i32
    %c0_i32_0 = arith.constant 0 : i32
    return %c0_i32, %arg0 : i32, i32
  }
  func.func @transform_1(%arg0: i32) -> (i32, i32) {
    %c0_i32 = arith.constant 0 : i32
    %c0_i32_0 = arith.constant 0 : i32
    return %c0_i32, %arg0 : i32, i32
  }
  func.func @transform_2(%arg0: i32) -> (i32, i32) {
    %c0_i32 = arith.constant 0 : i32
    %c0_i32_0 = arith.constant 0 : i32
    %c0_i32_1 = arith.constant 0 : i32
    return %c0_i32, %c0_i32_0 : i32, i32
  }
  func.func @transform_3(%arg0: i32) -> (i32, i32) {
    %c0_i32 = arith.constant 0 : i32
    %c0_i32_0 = arith.constant 0 : i32
    %c0_i32_1 = arith.constant 0 : i32
    return %c0_i32, %c0_i32_0 : i32, i32
  }
  func.func @transform_4(%arg0: i32) -> (i32, i32) {
    %c0_i32 = arith.constant 0 : i32
    %c0_i32_0 = arith.constant 0 : i32
    %c0_i32_1 = arith.constant 0 : i32
    return %c0_i32, %c0_i32_0 : i32, i32
  }
  func.func @transform_5(%arg0: i32) -> (i32, i32) {
    %c0_i32 = arith.constant 0 : i32
    %c0_i32_0 = arith.constant 0 : i32
    %c0_i32_1 = arith.constant 0 : i32
    return %c0_i32, %c0_i32_0 : i32, i32
  }
  func.func @transform_6(%arg0: i32) -> (i32, i32) {
    %c0_i32 = arith.constant 0 : i32
    %c0_i32_0 = arith.constant 0 : i32
    %c0_i32_1 = arith.constant 0 : i32
    return %c0_i32, %c0_i32_0 : i32, i32
  }
  func.func @transform_7(%arg0: i32) -> (i32, i32) {
    %c0_i32 = arith.constant 0 : i32
    %c0_i32_0 = arith.constant 0 : i32
    %c0_i32_1 = arith.constant 0 : i32
    return %c0_i32, %c0_i32_0 : i32, i32
  }
  func.func @transform_8(%arg0: i32) -> (i32, i32) {
    %c0_i32 = arith.constant 0 : i32
    %c0_i32_0 = arith.constant 0 : i32
    %c0_i32_1 = arith.constant 0 : i32
    return %c0_i32, %c0_i32_0 : i32, i32
  }
  func.func @transform_9(%arg0: i32) -> (i32, i32) {
    %c0_i32 = arith.constant 0 : i32
    %c0_i32_0 = arith.constant 0 : i32
    %c0_i32_1 = arith.constant 0 : i32
    return %c0_i32, %c0_i32_0 : i32, i32
  }
  func.func @transform_10(%arg0: i32) -> (i32, i32) {
    %c0_i32 = arith.constant 0 : i32
    %c0_i32_0 = arith.constant 0 : i32
    %c0_i32_1 = arith.constant 0 : i32
    return %c0_i32, %c0_i32_0 : i32, i32
  }
  func.func @transform_11(%arg0: i32) -> (i32, i32) {
    %c0_i32 = arith.constant 0 : i32
    %c0_i32_0 = arith.constant 0 : i32
    return %c0_i32, %arg0 : i32, i32
  }
  func.func @transform_12(%arg0: i32) -> (i32, i32) {
    %c0_i32 = arith.constant 0 : i32
    %c0_i32_0 = arith.constant 0 : i32
    return %c0_i32, %arg0 : i32, i32
  }
}

</mosaic_0001>

<bundles_post_ra>
// kernel: tpu_custom_call.1
= control target key start
LH: loop header
LB: loop body
LE: loop exit
PB: predicated region body
PF: predicated region fallthrough
CT: control target
= control target key end

     0   :  { %18 = vsyncpa [#allocation3], 0  ;;  %vm159_vm0 = vcmask 261120   ;;  %v989_v2 = vmov 0.0   ;;  %v990_v5 = vmov 0   ;;  %s1246_s0 = inlined_call_operand.vmem [shape: f32[4,128], index: 0, kind: input, shape index: {}]   ;;  %s1247_s1 = inlined_call_operand.vmem [shape: f32[2,128], index: 1, kind: input, shape index: {}]   ;;  %s1248_s2 = inlined_call_operand.vmem [shape: f32[32,32], index: 2, kind: input, shape index: {}]   ;;  %s1249_s3 = inlined_call_operand.vmem [shape: f32[32,1], index: 3, kind: input, shape index: {}]   ;;  %s1250_s4 = inlined_call_operand.vmem [shape: f32[32,1], index: 4, kind: input, shape index: {}]   ;;  %s1251_s5 = inlined_call_operand.vmem [shape: f32[32,32], index: 5, kind: input, shape index: {}]   ;;  %s1252_s6 = inlined_call_operand.vmem [shape: f32[32,1], index: 6, kind: input, shape index: {}]   ;;  %s1253_s7 = inlined_call_operand.vmem [shape: f32[32,32], index: 7, kind: input, shape index: {}]   ;;  %s1254_s8 = inlined_call_operand.vmem [shape: f32[32,1], index: 8, kind: input, shape index: {}]   ;;  %s1255_s9 = inlined_call_operand.vmem [shape: f32[2,32], index: 9, kind: input, shape index: {}]   ;;  %s1256_s10 = inlined_call_operand.vmem [shape: f32[2,1], index: 10, kind: input, shape index: {}]   ;;  %s1257_s11 = inlined_call_operand.hbm [shape: f32[4,128], index: 11, kind: output, shape index: {0}]   ;;  %s1258_s12 = inlined_call_operand.hbm [shape: f32[2,128], index: 12, kind: output, shape index: {1}]  }
   0x1   :  { %v1062_v0 = vld [vmem:[%s1253_s7] sm:$0xff]  ;;  %v1067_v1 = vld [vmem:[%s1253_s7 + $0x8] sm:$0xff]  ;;  %854 = vmatprep.subr.mxu0 %v989_v2  ;;  %v1075_v3 = vld [vmem:[%s1253_s7 + $0x10] sm:$0xff]  ;;  %931 = vset.pattern.permute.xlu0 %v990_v5 }
   0x2   :  { %856 = vmatprep.mubr.msk.f32.mxu0 %vm159_vm0, %v1062_v0  ;;  %v60_v4 = vld [vmem:[%s1254_s8 + $0x18] sm:$0xff]  ;;  %855 = vmatpush3.msra.mxu0 %v989_v2  ;;  %v58_v6 = vld [vmem:[%s1254_s8 + $0x8] sm:$0xff]  ;;  %v59_v8 = vld [vmem:[%s1254_s8 + $0x10] sm:$0xff] }
   0x3   :  { %857 = vmatmul.mubr.msk.f32.vlgmr.msra.gmra.mxu0 %vm159_vm0, %v1067_v1  ;;  %78 = vperm.xlu0 %931, %v60_v4   ;;  %v1091_v7 = vld [vmem:[%s1253_s7 + $0x18] sm:$0xff]  ;;  %v57_v9 = vld [vmem:[%s1254_s8] sm:$0xff] }
   0x4   :  { %859 = vmatprep.mubr.msk.f32.mxu0 %vm159_vm0, %v1075_v3  ;;  %932 = vset.pattern.permute.xlu1 %v990_v5 }
   0x5   :  { %68 = vperm.xlu1 %932, %v58_v6   ;;  %862 = vmatprep.subr.mxu1 %v989_v2 }
   0x7   :  { %860 = vmatmul.mubr.msk.f32.gmra.mxu0 %vm159_vm0, %v1091_v7  ;;  %73 = vperm.xlu0 %931, %v59_v8  }
   0x8   :  { %19 = vsyncpa [#allocation5], 0  ;;  %v81_v10 = vld [vmem:[%s1256_s10] sm:$0x3]  ;;  %v138_v11 = vld [vmem:[%s1249_s3 + $0x18] sm:$0xff]  ;;  %vm991_vm1 = vmmov 0   ;;  %v361_v5 = vlaneseq }
   0x9   :  { %63 = vperm.xlu1 %932, %v57_v9   ;;  %v137_v12 = vld [vmem:[%s1249_s3 + $0x10] sm:$0xff]  ;;  %v90_v13 = vld [vmem:[%s1250_s4 + $0x18] sm:$0xff]  ;;  %v136_v14 = vld [vmem:[%s1249_s3 + $0x8] sm:$0xff]  ;;  %870 = vmatprep.mubr.msk.f32.mxu1 %vm991_vm1, %v989_v2 }
   0xa   :  { %v89_v15 = vld [vmem:[%s1250_s4 + $0x10] sm:$0xff]  ;;  %v135_v16 = vld [vmem:[%s1249_s3] sm:$0xff]  ;;  %v88_v17 = vld [vmem:[%s1250_s4 + $0x8] sm:$0xff]  ;;  %v362_v9 = vshrl.u32 %v361_v5, 7 }
   0xb   :  { %84 = vperm.xlu0 %931, %v81_v10   ;;  %v87_v18 = vld [vmem:[%s1250_s4] sm:$0xff]  ;;  %v114_v19 = vld [vmem:[%s1252_s6 + $0x18] sm:$0xff]  ;;  %v113_v20 = vld [vmem:[%s1252_s6 + $0x10] sm:$0xff] }
   0xc   :  { %v112_v21 = vld [vmem:[%s1252_s6 + $0x8] sm:$0xff]  ;;  %v111_v22 = vld [vmem:[%s1252_s6] sm:$0xff]  ;;  %v46_v42 = vld [vmem:[%s1248_s2 + $0x10] sm:$0xff] }
   0xd   :  { %156 = vperm.xlu1 %932, %v138_v11   ;;  %v44_v23 = vld [vmem:[%s1248_s2] sm:$0xff]  ;;  %v45_v41 = vld [vmem:[%s1248_s2 + $0x8] sm:$0xff]  ;;  %v47_v43 = vld [vmem:[%s1248_s2 + $0x18] sm:$0xff] }
   0xe   :  { %881 = vmatprep.mubr.msk.f32.mxu0 %vm159_vm0, %v44_v23  ;;  %v1164_v40 = vld [vmem:[%s1255_s9] sm:$0x3] }
   0xf   :  { %151 = vperm.xlu0 %931, %v137_v12   ;;  %v48_v44 = vld [vmem:[%s1251_s5] sm:$0xff] }
  0x10   :  { %v1190_v45 = vld [vmem:[%s1246_s0] sm:$0xf] }
  0x11   :  { %108 = vperm.xlu1 %932, %v90_v13   ;;  %v345_v46 = vrot.slane %v1190_v45, 2 }
  0x13   :  { %146 = vperm.xlu0 %931, %v136_v14   ;;  %v1202_v14 = vld [vmem:[%s1247_s1] sm:$0x3] }
  0x15   :  { %103 = vperm.xlu1 %932, %v89_v15  }
  0x17   :  { %141 = vperm.xlu0 %931, %v135_v16   ;;  %v363_v16 = vsub.s32 0, %v362_v9 }
  0x19   :  { %98 = vperm.xlu1 %932, %v88_v17  }
  0x1b   :  { %93 = vperm.xlu0 %931, %v87_v18  }
  0x1d   :  { %132 = vperm.xlu1 %932, %v114_v19  }
  0x1f   :  { %127 = vperm.xlu0 %931, %v113_v20  }
  0x21   :  { %122 = vperm.xlu1 %932, %v112_v21  }
  0x23   :  { %117 = vperm.xlu0 %931, %v111_v22  }
  0x7e   :  { %v1147_v24 = vpop.permute.xlu0 %78 }
  0x80   :  { %v1149_v26 = vpop.permute.xlu1 %68 }
  0x82   :  { %v1152_v30 = vpop.permute.xlu0 %73 }
  0x84   :  { %v1156_v35 = vpop.permute.xlu1 %63 }
  0x86   :  { %v1193_v47 = vpop.permute.xlu0 %84 }
  0x88   :  { %v157_v4 = vpop.permute.xlu1 %156 }
  0x8a   :  { %v152_v6 = vpop.permute.xlu0 %151 }
  0x8c   :  { %v109_v11 = vpop.permute.xlu1 %108 }
  0x8e   :  { %v147_v13 = vpop.permute.xlu0 %146 }
  0x90   :  { %v104_v19 = vpop.permute.xlu1 %103 }
  0x92   :  { %v142_v21 = vpop.permute.xlu0 %141 }
  0xc3   :  { %v858_v25 = vpop.f32.mrf.mxu0 }
  0xc4   :  { %v244_v32 = vadd.f32 %v858_v25, %v1149_v26 }
  0xc5   :  { %v238_v27 = vpop.f32.mrf.mxu0 }
  0xc6   :  { %v239_v36 = vadd.f32 %v238_v27, %v1156_v35  ;;  %v258_v38 = vmax.f32 %v244_v32, 0.0 }
  0xc7   :  { %v861_v28 = vpop.f32.mrf.mxu0 }
  0xc8   :  { %v254_v29 = vadd.f32 %v861_v28, %v1147_v24  ;;  %v257_v39 = vmax.f32 %v239_v36, 0.0 }
  0xc9   :  { %v248_v31 = vpop.f32.mrf.mxu0 }
  0xca   :  { %v260_v33 = vmax.f32 %v254_v29, 0.0  ;;  %v249_v34 = vadd.f32 %v248_v31, %v1152_v30 }
  0xcc   :  { %v259_v37 = vmax.f32 %v249_v34, 0.0  ;;  %863 = vmatpush3.msra.mxu1 %v260_v33  ;;  %873 = vmatprep.subr.mxu0 %v260_v33 }
  0xcd   :  { %864 = vmatprep.subr.mxu1 %v989_v2  ;;  %874 = vmatpush3.msra.mxu0 %v260_v33 }
  0xce   :  { %865 = vmatpush3.msra.mxu1 %v259_v37  ;;  %875 = vmatprep.subr.mxu0 %v259_v37 }
  0xcf   :  { %866 = vmatprep.subr.mxu1 %v989_v2  ;;  %876 = vmatpush3.msra.mxu0 %v259_v37  ;;  %v99_v37 = vpop.permute.xlu1 %98 }
  0xd0   :  { %867 = vmatpush3.msra.mxu1 %v258_v38  ;;  %877 = vmatprep.subr.mxu0 %v258_v38 }
  0xd1   :  { %868 = vmatprep.subr.mxu1 %v989_v2  ;;  %878 = vmatpush3.msra.mxu0 %v258_v38 }
  0xd2   :  { %869 = vmatpush3.msra.mxu1 %v257_v39  ;;  %879 = vmatprep.subr.mxu0 %v257_v39 }
  0xd3   :  { %871 = vmatmul.mubr.msk.f32.vlgmr.msra.gmra.mxu1 %vm159_vm0, %v1164_v40  ;;  %880 = vmatpush3.msra.mxu0 %v257_v39 }
  0xd4   :  { %882 = vmatmul.mubr.msk.f32.vlgmr.msra.gmra.mxu0 %vm159_vm0, %v45_v41  ;;  %895 = vmatprep.mubr.msk.f32.mxu1 %vm159_vm0, %v48_v44  ;;  %v94_v41 = vpop.permute.xlu0 %93 }
  0xd5   :  { %884 = vmatprep.mubr.msk.f32.mxu0 %vm159_vm0, %v46_v42 }
  0xd8   :  { %885 = vmatmul.mubr.msk.f32.gmra.mxu0 %vm159_vm0, %v47_v43 }
  0xd9   :  { %909 = vmatprep.mubr.msk.f32.mxu0 %vm159_vm0, %v1062_v0 }
 0x193   :  { %v330_v48 = vpop.f32.mrf.mxu1 }
 0x194   :  { %v331_v49 = vadd.f32 %v330_v48, %v1193_v47  ;;  %v883_v8 = vpop.f32.mrf.mxu0 }
 0x195   :  { %v872_v50 = vpop.f32.mrf.mxu1 }
 0x196   :  { %v334_v51 = vsub.f32 %v331_v49, %v1190_v45  ;;  %v347_v52 = vsub.f32 %v331_v49, %v345_v46  ;;  %579 = vst [vmem:[#allocation2] sm:$0x3] %v331_v49  ;;  %v447_v10 = vpop.f32.mrf.mxu0  ;;  %v49_v49 = vld [vmem:[%s1251_s5 + $0x8] sm:$0xff]  ;;  %v50_v50 = vld [vmem:[%s1251_s5 + $0x10] sm:$0xff] }
 0x198   :  { %v335_v53 = vmul.f32 %v334_v51, %v334_v51  ;;  %v348_v54 = vmul.f32 %v347_v52, %v347_v52  ;;  %v886_v17 = vpop.f32.mrf.mxu0  ;;  %v51_v51 = vld [vmem:[%s1251_s5 + $0x18] sm:$0xff]  ;;  %v133_v52 = vpop.permute.xlu1 %132  ;;  %s992_s5 = smov [#allocation2]  }
 0x199   :  { %s775_s18 = sshll.u32 %s992_s5, 4  ;;  %s776_s18 = int_to_ptr.vmem [resolvable:$true] %s775_s18 }
 0x19a   :  { %v337_v55 = vrot.slane %v335_v53, 1  ;;  %v350_v56 = vrot.slane %v348_v54, 1  ;;  %v457_v22 = vpop.f32.mrf.mxu0  ;;  %s945_s19 = scalar_lea.vmem %s776_s18, 64  ;;  %p950_p1 = scmp.lt.s32.totalorder %s776_s18, %s776_s18 }
 0x19b   :  { %p946_p0 = scmp.ne.s32.totalorder %s776_s18, %s945_s19  ;;  %p951_p2 = scmp.lt.s32.totalorder %s945_s19, %s945_s19 }
 0x19c   :  { %v339_v57 = vadd.f32 %v337_v55, %v335_v53  ;;  %v352_v58 = vadd.f32 %v350_v56, %v348_v54  ;;  %v128_v54 = vpop.permute.xlu0 %127 }
 0x19d   :  { %p952_p3 = por %p951_p2, %p950_p1 }
 0x19e   :  { %v340_v59 = vadd.f32 0.0001, %v339_v57  ;;  %v353_v60 = vadd.f32 0.0001, %v352_v58  ;;  %v123_v58 = vpop.permute.xlu1 %122 }
 0x19f   :  { %p953_p4 = pnand %p952_p3, %p946_p0 }
 0x1a0   :  { %933 = vrcp.f32 %v340_v59 }
 0x1a1   :  { %935 = vrcp.f32 %v353_v60 }
 0x1ad   :  { %v934_v61 = vpop.eup %933 }
 0x1ae   :  { %v936_v62 = vpop.eup %935 }
 0x1af   :  { %v356_v63 = vadd.f32 %v936_v62, %v934_v61 }
 0x1b1   :  { %v357_v0 = vadd.f32 0.1, %v356_v63  ;;  %v118_v63 = vpop.permute.xlu0 %117 }
 0x1b3   :  { %937 = vlog2.f32 %v357_v0 }
 0x1c0   :  { %v938_v12 = vpop.eup %937 }
 0x1c1   :  { %v359_v15 = vmul.f32 0.6931472, %v938_v12 }
 0x1c3   :  { %v360_v18 = vadd.f32 %v359_v15, %v1202_v14 }
 0x1c5   :  { %v364_v20 = vrot.slane %v360_v18, %v363_v16  ;;  %580 = vst [vmem:[#allocation4] sm:$0x1] %v360_v18 }
 0x1c7   :  { %v366_v23 = vmul.f32 %v364_v20, %v147_v13  ;;  %v365_v25 = vmul.f32 %v364_v20, %v142_v21  ;;  %v368_v27 = vmul.f32 %v364_v20, %v157_v4  ;;  %v367_v28 = vmul.f32 %v364_v20, %v152_v6 }
 0x1c9   :  { %v453_v29 = vadd.f32 %v883_v8, %v366_v23  ;;  %v463_v31 = vadd.f32 %v886_v17, %v368_v27  ;;  %v458_v32 = vadd.f32 %v457_v22, %v367_v28  ;;  %v448_v33 = vadd.f32 %v447_v10, %v365_v25 }
 0x1cb   :  { %v469_v34 = vadd.f32 %v463_v31, %v109_v11  ;;  %v468_v36 = vadd.f32 %v458_v32, %v104_v19  ;;  %v467_v38 = vadd.f32 %v453_v29, %v99_v37  ;;  %v466_v42 = vadd.f32 %v448_v33, %v94_v41 }
 0x1cd   :  { %v473_v39 = vmax.f32 %v469_v34, 0.0  ;;  %v472_v43 = vmax.f32 %v468_v36, 0.0  ;;  %v471_v44 = vmax.f32 %v467_v38, 0.0  ;;  %v470_v48 = vmax.f32 %v466_v42, 0.0 }
 0x1cf   :  { %887 = vmatprep.subr.mxu1 %v473_v39 }
 0x1d0   :  { %888 = vmatpush3.msra.mxu1 %v473_v39 }
 0x1d1   :  { %889 = vmatprep.subr.mxu1 %v472_v43 }
 0x1d2   :  { %890 = vmatpush3.msra.mxu1 %v472_v43 }
 0x1d3   :  { %891 = vmatprep.subr.mxu1 %v471_v44 }
 0x1d4   :  { %892 = vmatpush3.msra.mxu1 %v471_v44 }
 0x1d5   :  { %893 = vmatprep.subr.mxu1 %v470_v48 }
 0x1d6   :  { %894 = vmatpush3.msra.mxu1 %v470_v48 }
 0x1d7   :  { %896 = vmatmul.mubr.msk.f32.vlgmr.msra.gmra.mxu1 %vm159_vm0, %v49_v49  ;;  %915 = vmatprep.subr.mxu1 %v989_v2 }
 0x1d8   :  { %898 = vmatprep.mubr.msk.f32.mxu1 %vm159_vm0, %v50_v50 }
 0x1db   :  { %899 = vmatmul.mubr.msk.f32.gmra.mxu1 %vm159_vm0, %v51_v51 }
 0x1dc   :  { %923 = vmatprep.mubr.msk.f32.mxu1 %vm991_vm1, %v989_v2 }
 0x297   :  { %v897_v53 = vpop.f32.mrf.mxu1 }
 0x298   :  { %v558_v60 = vadd.f32 %v897_v53, %v123_v58 }
 0x299   :  { %v552_v55 = vpop.f32.mrf.mxu1 }
 0x29a   :  { %v553_v0 = vadd.f32 %v552_v55, %v118_v63  ;;  %v572_v5 = vmax.f32 %v558_v60, 0.0 }
 0x29b   :  { %v900_v56 = vpop.f32.mrf.mxu1 }
 0x29c   :  { %v568_v57 = vadd.f32 %v900_v56, %v133_v52  ;;  %v571_v6 = vmax.f32 %v553_v0, 0.0 }
 0x29d   :  { %v562_v59 = vpop.f32.mrf.mxu1 }
 0x29e   :  { %v574_v61 = vmax.f32 %v568_v57, 0.0  ;;  %v563_v62 = vadd.f32 %v562_v59, %v128_v54 }
 0x2a0   :  { %v573_v4 = vmax.f32 %v563_v62, 0.0  ;;  %901 = vmatprep.subr.mxu0 %v574_v61 }
 0x2a1   :  { %902 = vmatpush3.msra.mxu0 %v574_v61 }
 0x2a2   :  { %903 = vmatprep.subr.mxu0 %v573_v4 }
 0x2a3   :  { %904 = vmatpush3.msra.mxu0 %v573_v4 }
 0x2a4   :  { %905 = vmatprep.subr.mxu0 %v572_v5 }
 0x2a5   :  { %906 = vmatpush3.msra.mxu0 %v572_v5 }
 0x2a6   :  { %907 = vmatprep.subr.mxu0 %v571_v6 }
 0x2a7   :  { %908 = vmatpush3.msra.mxu0 %v571_v6 }
 0x2a8   :  { %910 = vmatmul.mubr.msk.f32.vlgmr.msra.gmra.mxu0 %vm159_vm0, %v1067_v1 }
 0x2a9   :  { %912 = vmatprep.mubr.msk.f32.mxu0 %vm159_vm0, %v1075_v3 }
 0x2ac   :  { %913 = vmatmul.mubr.msk.f32.gmra.mxu0 %vm159_vm0, %v1091_v7 }
 0x368   :  { %v911_v8 = vpop.f32.mrf.mxu0 }
 0x369   :  { %v653_v13 = vadd.f32 %v911_v8, %v1149_v26 }
 0x36a   :  { %v647_v9 = vpop.f32.mrf.mxu0 }
 0x36b   :  { %v648_v17 = vadd.f32 %v647_v9, %v1156_v35  ;;  %v667_v3 = vmax.f32 %v653_v13, 0.0 }
 0x36c   :  { %v914_v10 = vpop.f32.mrf.mxu0 }
 0x36d   :  { %v663_v11 = vadd.f32 %v914_v10, %v1147_v24  ;;  %v666_v7 = vmax.f32 %v648_v17, 0.0 }
 0x36e   :  { %v657_v12 = vpop.f32.mrf.mxu0 }
 0x36f   :  { %v669_v15 = vmax.f32 %v663_v11, 0.0  ;;  %v658_v16 = vadd.f32 %v657_v12, %v1152_v30 }
 0x371   :  { %v668_v1 = vmax.f32 %v658_v16, 0.0  ;;  %916 = vmatpush3.msra.mxu1 %v669_v15 }
 0x372   :  { %917 = vmatprep.subr.mxu1 %v989_v2 }
 0x373   :  { %918 = vmatpush3.msra.mxu1 %v668_v1 }
 0x374   :  { %919 = vmatprep.subr.mxu1 %v989_v2 }
 0x375   :  { %920 = vmatpush3.msra.mxu1 %v667_v3 }
 0x376   :  { %921 = vmatprep.subr.mxu1 %v989_v2 }
 0x377   :  { %922 = vmatpush3.msra.mxu1 %v666_v7 }
 0x378   :  { %924 = vmatmul.mubr.msk.f32.vlgmr.msra.gmra.mxu1 %vm159_vm0, %v1164_v40 }
 0x438   :  { %v736_v24 = vpop.f32.mrf.mxu1 }
 0x439   :  { %v737_v26 = vadd.f32 %v736_v24, %v1193_v47 }
 0x43a   :  { %v925_v30 = vpop.f32.mrf.mxu1 }
 0x43b   :  { %v740_v35 = vsub.f32 %v737_v26, %v1190_v45  ;;  %v750_v18 = vsub.f32 %v737_v26, %v345_v46  ;;  %767 = vst [vmem:[#allocation2 + $0x2] sm:$0x3] %v737_v26 }
 0x43c   :  { %956 = shalt.err (!%p953_p4)
}
 0x43d   :  { %778 = dma.vmem_to_hbm [thread:$0]  %s776_s18, 64, %s1257_s11, [#allocation3]   ;;  %v741_v2 = vmul.f32 %v740_v35, %v740_v35  ;;  %v751_v40 = vmul.f32 %v750_v18, %v750_v18  ;;  %v764_v28 = vrot.slane %v1202_v14, 1 }
 0x43e   :  { %s993_s20 = smov [#allocation4]  }
 0x43f   :  { %v743_v47 = vrot.slane %v741_v2, 1  ;;  %v753_v19 = vrot.slane %v751_v40, 1  ;;  %s785_s11 = sshll.u32 %s993_s20, 4  ;;  %s786_s11 = int_to_ptr.vmem [resolvable:$true] %s785_s11 }
 0x440   :  { %s965_s21 = scalar_lea.vmem %s786_s11, 32  ;;  %p970_p6 = scmp.lt.s32.totalorder %s786_s11, %s786_s11 }
 0x441   :  { %v745_v20 = vadd.f32 %v743_v47, %v741_v2  ;;  %v755_v21 = vadd.f32 %v753_v19, %v751_v40  ;;  %p966_p5 = scmp.ne.s32.totalorder %s786_s11, %s965_s21  ;;  %p971_p7 = scmp.lt.s32.totalorder %s965_s21, %s965_s21 }
 0x443   :  { %v746_v45 = vadd.f32 0.0001, %v745_v20  ;;  %v756_v46 = vadd.f32 0.0001, %v755_v21  ;;  %p972_p8 = por %p971_p7, %p970_p6 }
 0x445   :  { %939 = vrcp.f32 %v746_v45  ;;  %p973_p9 = pnand %p972_p8, %p966_p5 }
 0x446   :  { %941 = vrcp.f32 %v756_v46 }
 0x452   :  { %v940_v22 = vpop.eup %939 }
 0x453   :  { %v942_v23 = vpop.eup %941 }
 0x454   :  { %v759_v25 = vadd.f32 %v942_v23, %v940_v22 }
 0x456   :  { %v760_v27 = vadd.f32 0.1, %v759_v25 }
 0x458   :  { %943 = vlog2.f32 %v760_v27 }
 0x465   :  { %v944_v29 = vpop.eup %943 }
 0x466   :  { %v762_v31 = vmul.f32 0.6931472, %v944_v29 }
 0x468   :  { %v766_v32 = vadd.f32 %v764_v28, %v762_v31 }
 0x46a   :  { %768 = vst [vmem:[#allocation4 + $0x1] sm:$0x1] %v766_v32 }
 0x46b   :  { %976 = shalt.err (!%p973_p9)
}
 0x46c   :  { %788 = dma.vmem_to_hbm [thread:$0]  %s786_s11, 32, %s1258_s12, [#allocation5]  }
 0x46d   :  { %985 = dma.done.wait [#allocation3], 64  }
 0x46e   :  { %986 = vsyncadd [#allocation3], 4294967232 }
 0x46f   :  { %987 = dma.done.wait [#allocation5], 32  }
 0x470   :  { %988 = vsyncadd [#allocation5], 4294967264 }
 0x471   :  { %795 = vsyncpa [#allocation3], 1 }
 0x472   :  { %796 = vsyncpa [#allocation5], 1 }

</bundles_post_ra>
